<compile_context>
chip_gen: v7x
topology: tpu7x:2x2x1
jax: 0.10.0
libtpu: 0.0.40
codegen_flags: <defaults>
</compile_context>

<pallas_src>
import functools

import jax
import jax.numpy as jnp
from jax.experimental import pallas as pl
from jax.experimental.pallas import tpu as pltpu


def _round_up(a, b):
    return (a + b - 1) // b * b


def _highway_kernel(x_ref, wf_ref, bf_ref, o_ref, *, num_layers, hp):
    # x_ref: (tm, Hp); wf_ref: (L, Hp, 2*Hp) fused [transform | gate];
    # bf_ref: (L, 1, 2*Hp); o_ref: (tm, Hp).
    x = x_ref[...].astype(jnp.float32)
    for l in range(num_layers):  # static, small L -> unrolled
        y = jnp.dot(x.astype(wf_ref.dtype), wf_ref[l],
                    preferred_element_type=jnp.float32) + bf_ref[l]
        t = jnp.maximum(y[:, :hp], 0.0)        # relu(transform(x))
        g = jax.nn.sigmoid(y[:, hp:])          # sigmoid(gate(x))
        x = g * (t - x) + x                    # == g*t + (1-g)*x
    o_ref[...] = x.astype(o_ref.dtype)


def highway_encoder(x, wt, bt, wg, bg, *, tm=256, weights_dtype=None):
    """x: (B, S, H). wt/wg: (L, H, H) already (in, out). bt/bg: (L, H)."""
    B, S, H = x.shape
    L = wt.shape[0]
    M = B * S

    w_dtype = jnp.dtype(weights_dtype) if weights_dtype is not None else wt.dtype
    Hp = _round_up(H, 128)  # lane-dense last dim
    # Row tile: multiple of 8, no larger than needed, >=2 grid steps when possible.
    tm_eff = max(8, min(tm, _round_up(pl.cdiv(M, 2), 8)))
    M_pad = _round_up(M, tm_eff)
    grid = (M_pad // tm_eff,)

    # Fuse + zero-pad weights: columns [0:Hp) = transform, [Hp:2Hp) = gate.
    wf = jnp.zeros((L, Hp, 2 * Hp), w_dtype)
    wf = wf.at[:, :H, :H].set(wt.astype(w_dtype))
    wf = wf.at[:, :H, Hp:Hp + H].set(wg.astype(w_dtype))
    bf = jnp.zeros((L, 1, 2 * Hp), jnp.float32)
    bf = bf.at[:, 0, :H].set(bt.astype(jnp.float32))
    bf = bf.at[:, 0, Hp:Hp + H].set(bg.astype(jnp.float32))

    x2 = x.reshape(M, H)
    x2 = jnp.pad(x2, ((0, M_pad - M), (0, Hp - H)))

    # Explicit VMEM budget: (double-buffered) weights/bias + x/out + temporaries.
    w_item = jnp.dtype(w_dtype).itemsize
    weight_bytes = 2 * (L * Hp * 2 * Hp * w_item + L * 2 * Hp * 4)
    io_bytes = 2 * 2 * tm_eff * Hp * x.dtype.itemsize
    temp_bytes = 8 * tm_eff * Hp * 4
    vmem_limit = weight_bytes + io_bytes + temp_bytes + (4 << 20)
    vmem_limit = int(min(max(vmem_limit, 8 << 20), 96 << 20))

    kernel = functools.partial(_highway_kernel, num_layers=L, hp=Hp)
    out = pl.pallas_call(
        kernel,
        out_shape=jax.ShapeDtypeStruct((M_pad, Hp), x.dtype),
        grid_spec=pl.GridSpec(
            grid=grid,
            in_specs=[
                pl.BlockSpec((tm_eff, Hp), lambda i: (i, 0)),
                pl.BlockSpec((L, Hp, 2 * Hp), lambda i: (0, 0, 0)),
                pl.BlockSpec((L, 1, 2 * Hp), lambda i: (0, 0, 0)),
            ],
            out_specs=pl.BlockSpec((tm_eff, Hp), lambda i: (i, 0)),
        ),
        compiler_params=pltpu.CompilerParams(
            dimension_semantics=("parallel",),
            vmem_limit_bytes=vmem_limit,
        ),
    )(x2, wf, bf)
    return out[:M, :H].reshape(B, S, H)


def _reference(x, wt, bt, wg, bg):
    B, S, H = x.shape
    y = x.reshape(-1, H).astype(jnp.float32)
    for l in range(wt.shape[0]):
        t = jnp.maximum(y @ wt[l] + bt[l], 0.0)
        g = jax.nn.sigmoid(y @ wg[l] + bg[l])
        y = g * t + (1.0 - g) * y
    return y.reshape(B, S, H)


if __name__ == "__main__":
    num_layers = 2
    batch, seq, hidden = 2, 8, 32

    key = jax.random.PRNGKey(0)
    kx, kwt, kbt, kwg, kbg = jax.random.split(key, 5)

    # Deterministic init, mimicking nn.Linear uniform(-1/sqrt(H), 1/sqrt(H)).
    bound = 1.0 / jnp.sqrt(jnp.float32(hidden))
    wt = jax.random.uniform(kwt, (num_layers, hidden, hidden), jnp.float32, -bound, bound)
    bt = jax.random.uniform(kbt, (num_layers, hidden), jnp.float32, -bound, bound)
    wg = jax.random.uniform(kwg, (num_layers, hidden, hidden), jnp.float32, -bound, bound)
    bg = jax.random.uniform(kbg, (num_layers, hidden), jnp.float32, -bound, bound)

    x = jax.random.normal(kx, (batch, seq, hidden), jnp.float32)

    out = highway_encoder(x, wt, bt, wg, bg)
    out = jax.block_until_ready(out)

    ref = _reference(x, wt, bt, wg, bg)
    assert out.shape == x.shape and out.dtype == x.dtype
    assert jnp.max(jnp.abs(out - ref)) < 1e-5, "mismatch vs. pure-JAX reference"

    print("KERNEL_OK")
</pallas_src>

<mosaic_0001>
module attributes {stable_mosaic.version = 11 : i64} {
  func.func @_highway_kernel(%arg0: i32, %arg1: memref<8x128xf32, #tpu.memory_space<vmem>>, %arg2: memref<2x128x256xf32, #tpu.memory_space<vmem>>, %arg3: memref<2x1x256xf32, #tpu.memory_space<vmem>>, %arg4: memref<8x128xf32, #tpu.memory_space<vmem>>) attributes {dimension_semantics = [#tpu.dimension_semantics<parallel>], iteration_bounds = array<i64: 2>, scalar_prefetch = 0 : i64, scratch_operands = 0 : i64, tpu.core_type = #tpu.core_type<tc>, window_params = [{transform_indices = @transform_0, window_bounds = array<i64: 8, 128>}, {pipeline_mode = #tpu.pipeline_mode<synchronous>, transform_indices = @transform_1, window_bounds = array<i64: 2, 128, 256>}, {pipeline_mode = #tpu.pipeline_mode<synchronous>, transform_indices = @transform_2, window_bounds = array<i64: 2, 1, 256>}, {transform_indices = @transform_3, window_bounds = array<i64: 8, 128>}]} {
    %c0 = arith.constant 0 : index
    %c0_0 = arith.constant 0 : index
    %0 = vector.load %arg1[%c0, %c0_0] : memref<8x128xf32, #tpu.memory_space<vmem>>, vector<8x128xf32>
    %c0_1 = arith.constant 0 : index
    %c0_2 = arith.constant 0 : index
    %c0_3 = arith.constant 0 : index
    %1 = vector.load %arg2[%c0_1, %c0_2, %c0_3] : memref<2x128x256xf32, #tpu.memory_space<vmem>>, vector<1x128x256xf32>
    %2 = vector.shape_cast %1 : vector<1x128x256xf32> to vector<128x256xf32>
    %cst = arith.constant dense<0.000000e+00> : vector<8x256xf32>
    %3 = tpu.matmul %0, %2, %cst {dimension_numbers = #tpu.dot_dimension_numbers<[1], [0], [0], [1], [0, 0, 1, 1], [], []>} : vector<8x128xf32>, vector<128x256xf32>, vector<8x256xf32> -> vector<8x256xf32>
    %c0_4 = arith.constant 0 : index
    %c0_5 = arith.constant 0 : index
    %c0_6 = arith.constant 0 : index
    %4 = vector.load %arg3[%c0_4, %c0_5, %c0_6] : memref<2x1x256xf32, #tpu.memory_space<vmem>>, vector<1x1x256xf32>
    %5 = vector.shape_cast %4 : vector<1x1x256xf32> to vector<1x256xf32>
    %6 = vector.broadcast %5 : vector<1x256xf32> to vector<8x256xf32>
    %7 = arith.addf %3, %6 : vector<8x256xf32>
    %8 = vector.extract_strided_slice %7 {offsets = [0, 0], sizes = [8, 128], strides = [1, 1]} : vector<8x256xf32> to vector<8x128xf32>
    %cst_7 = arith.constant 0.000000e+00 : f32
    %9 = vector.broadcast %cst_7 : f32 to vector<8x128xf32>
    %10 = arith.maximumf %8, %9 : vector<8x128xf32>
    %11 = vector.extract_strided_slice %7 {offsets = [0, 128], sizes = [8, 128], strides = [1, 1]} : vector<8x256xf32> to vector<8x128xf32>
    %12 = arith.negf %11 : vector<8x128xf32>
    %13 = math.exp %12 : vector<8x128xf32>
    %cst_8 = arith.constant 1.000000e+00 : f32
    %14 = vector.broadcast %cst_8 : f32 to vector<8x128xf32>
    %15 = arith.addf %14, %13 : vector<8x128xf32>
    %16 = arith.divf %14, %15 : vector<8x128xf32>
    %17 = arith.subf %10, %0 : vector<8x128xf32>
    %18 = arith.mulf %16, %17 : vector<8x128xf32>
    %19 = arith.addf %18, %0 : vector<8x128xf32>
    %c1 = arith.constant 1 : index
    %c0_9 = arith.constant 0 : index
    %c0_10 = arith.constant 0 : index
    %20 = vector.load %arg2[%c1, %c0_9, %c0_10] : memref<2x128x256xf32, #tpu.memory_space<vmem>>, vector<1x128x256xf32>
    %21 = vector.shape_cast %20 : vector<1x128x256xf32> to vector<128x256xf32>
    %cst_11 = arith.constant dense<0.000000e+00> : vector<8x256xf32>
    %22 = tpu.matmul %19, %21, %cst_11 {dimension_numbers = #tpu.dot_dimension_numbers<[1], [0], [0], [1], [0, 0, 1, 1], [], []>} : vector<8x128xf32>, vector<128x256xf32>, vector<8x256xf32> -> vector<8x256xf32>
    %c1_12 = arith.constant 1 : index
    %c0_13 = arith.constant 0 : index
    %c0_14 = arith.constant 0 : index
    %23 = vector.load %arg3[%c1_12, %c0_13, %c0_14] : memref<2x1x256xf32, #tpu.memory_space<vmem>>, vector<1x1x256xf32>
    %24 = vector.shape_cast %23 : vector<1x1x256xf32> to vector<1x256xf32>
    %25 = vector.broadcast %24 : vector<1x256xf32> to vector<8x256xf32>
    %26 = arith.addf %22, %25 : vector<8x256xf32>
    %27 = vector.extract_strided_slice %26 {offsets = [0, 0], sizes = [8, 128], strides = [1, 1]} : vector<8x256xf32> to vector<8x128xf32>
    %cst_15 = arith.constant 0.000000e+00 : f32
    %28 = vector.broadcast %cst_15 : f32 to vector<8x128xf32>
    %29 = arith.maximumf %27, %28 : vector<8x128xf32>
    %30 = vector.extract_strided_slice %26 {offsets = [0, 128], sizes = [8, 128], strides = [1, 1]} : vector<8x256xf32> to vector<8x128xf32>
    %31 = arith.negf %30 : vector<8x128xf32>
    %32 = math.exp %31 : vector<8x128xf32>
    %cst_16 = arith.constant 1.000000e+00 : f32
    %33 = vector.broadcast %cst_16 : f32 to vector<8x128xf32>
    %34 = arith.addf %33, %32 : vector<8x128xf32>
    %35 = arith.divf %33, %34 : vector<8x128xf32>
    %36 = arith.subf %29, %19 : vector<8x128xf32>
    %37 = arith.mulf %35, %36 : vector<8x128xf32>
    %38 = arith.addf %37, %19 : vector<8x128xf32>
    %c0_17 = arith.constant 0 : index
    %c0_18 = arith.constant 0 : index
    %39 = vector.load %arg4[%c0_17, %c0_18] : memref<8x128xf32, #tpu.memory_space<vmem>>, vector<8x128xf32>
    tpu.vector_store %arg4[%c0_17, %c0_18], %38 {strides = array<i32>} : memref<8x128xf32, #tpu.memory_space<vmem>>, vector<8x128xf32>,
    return
  }
  func.func @transform_0(%arg0: i32) -> (i32, i32) {
    %c0_i32 = arith.constant 0 : i32
    %c0_i32_0 = arith.constant 0 : i32
    return %arg0, %c0_i32 : i32, i32
  }
  func.func @transform_1(%arg0: i32) -> (i32, i32, i32) {
    %c0_i32 = arith.constant 0 : i32
    %c0_i32_0 = arith.constant 0 : i32
    %c0_i32_1 = arith.constant 0 : i32
    %c0_i32_2 = arith.constant 0 : i32
    return %c0_i32, %c0_i32_0, %c0_i32_1 : i32, i32, i32
  }
  func.func @transform_2(%arg0: i32) -> (i32, i32, i32) {
    %c0_i32 = arith.constant 0 : i32
    %c0_i32_0 = arith.constant 0 : i32
    %c0_i32_1 = arith.constant 0 : i32
    %c0_i32_2 = arith.constant 0 : i32
    return %c0_i32, %c0_i32_0, %c0_i32_1 : i32, i32, i32
  }
  func.func @transform_3(%arg0: i32) -> (i32, i32) {
    %c0_i32 = arith.constant 0 : i32
    %c0_i32_0 = arith.constant 0 : i32
    return %arg0, %c0_i32 : i32, i32
  }
}

</mosaic_0001>

<bundles_post_ra>
// kernel: tpu_custom_call.1
= control target key start
LH: loop header
LB: loop body
LE: loop exit
PB: predicated region body
PF: predicated region fallthrough
CT: control target
= control target key end

     0   :  { %8 = vsyncpa [#allocation3], 0  ;;  %s1068_s0 = inlined_call_operand.hbm [shape: f32[16,128], index: 0, kind: input, shape index: {}]   ;;  %s1069_s1 = inlined_call_operand.hbm [shape: f32[2,128,256], index: 1, kind: input, shape index: {}]   ;;  %s1070_s2 = inlined_call_operand.vmem [shape: f32[2,1,256], index: 2, kind: input, shape index: {}]   ;;  %s1071_s3 = inlined_call_operand.hbm [shape: f32[16,128], index: 3, kind: output, shape index: {}]  }
   0x1   :  { %10 = vsyncpa [#allocation3 + $0x1], 0 }
   0x2   :  { %11 = vsyncpa [#allocation6], 0 }
   0x3   :  { %12 = vsyncpa [#allocation4], 0 }
   0x4   :  { %14 = vsyncpa [#allocation4 + $0x1], 0  ;;  %s854_s12 = smov 0   ;;  %s856_s13 = smov 0  }
   0x5   :  { %s858_s14 = smov 0   ;;  %s860_s15 = smov 0  }
   0x6 LB: > { %s875_s16 = sadd.s32 4294967295, %s826_s15   ;;  %s549_s17 = sadd.s32 4294967294, %s826_s15   ;;  %s826_s15 = sphi %s860_s15, %s1091_s15   ;;  %s822_s14 = sphi %s858_s14, %s1090_s14   ;;  %s818_s13 = sphi %s856_s13, %s1089_s13   ;;  %s814_s12 = sphi %s854_s12, %s1088_s12  }
   0x7   : > { %p40_p0 = scmp.ne.s32.totalorder %s818_s13, %s814_s12  ;;  %p1072_p1 = scmp.eq.s32.totalorder %s875_s16, 0 }
   0x8   : > { %p112_p3 = scmp.eq.s32.totalorder %s549_s17, 1  ;;  %p550_p5 = scmp.ge.s32.totalorder %s826_s15, 1 }
   0x9   : > { %p884_p4 = por %p1072_p1, %p40_p0  ;;  %p119_p7 = scmp.lt.s32.totalorder %s826_s15, 3 }
   0xa   : > { %p889_p6 = por %p112_p3, %p40_p0  ;;  %s828_s21 = smov [#allocation5]  }
   0xb   : > { %s1075_s18 = scalar_select %p884_p4, 1, 0 }
   0xc   : > { %s1076_s19 = scalar_select %p889_p6, 1, 0 }
   0xd   : > { %p894_p8 = pnand %p550_p5, %p119_p7  ;;  %s131_s22 = sshll.u32 %s828_s21, 4  ;;  %s898_s22 = int_to_ptr.vmem [resolvable:$true] %s131_s22 }
   0xe   : > { %s910_s24 = sadd.s32 1, %s826_s15   ;;  %s27_s25 = sadd.s32 1, %s822_s14 }
   0xf   : > { %s1077_s20 = scalar_select %p894_p8, 1, 0 }
  0x10   : > { %p638_p9 = pneg %p894_p8  ;;  %s24_s26 = ssub.s32 %s826_s15, %s910_s24 }
  0x11   : > { %s698_s29 = scalar_lea.hbm %s1069_s1, 8192 }
  0x12   : > { %p905_p11 = pnand %p638_p9, %p1072_p1  ;;  %p699_p12 = scmp.ne.s32.totalorder %s1069_s1, %s698_s29 }
  0x13   : > { %p705_p5 = scmp.lt.u32.totalorder %s698_s29, %s1069_s1 }
  0x14   : > { %p700_p13 = pneg %p905_p11 }
  0x16   : > { %p701_p0 = pnand %p700_p13, %p699_p12 }
  0x18   : > { %p702_p3 = pneg %p701_p0 }
  0x1a   : > { %p707_p7 = pnand %p705_p5, %p702_p3 }
  0x1c   : > { %710 = shalt.err (!%p707_p7)
}
  0x1d   : > { %s711_s7 = scalar_lea.vmem %s898_s22, 8192  ;;  %p719_p2 = scmp.lt.s32.totalorder %s898_s22, %s898_s22 }
  0x1e   : > { %p712_p9 = scmp.ne.s32.totalorder %s898_s22, %s711_s7  ;;  %p720_p6 = scmp.lt.s32.totalorder %s711_s7, %s711_s7 }
  0x20   : > { %p714_p10 = pnand %p712_p9, %p700_p13  ;;  %p721_p4 = por %p720_p6, %p719_p2 }
  0x22   : > { %p715_p1 = pneg %p714_p10 }
  0x24   : > { %p722_p8 = pnand %p721_p4, %p715_p1 }
  0x26   : > { %725 = shalt.err (!%p722_p8)
}
  0x27   : > { %s829_s8 = smov 256   ;;  %s830_s9 = smov 16  }
  0x28   : > { %641 = dma.hbm_to_vmem [thread:$0]  (!%p905_p11), %s1069_s1, 8192, %s898_s22, [#allocation6], %s829_s8, %s829_s8, %s830_s9  }
  0x29   : > { %p25_p2 = scmp.eq.s32.totalorder %s24_s26, 0  ;;  %p34_p1 = scmp.ne.s32.totalorder %s822_s14, %s818_s13 }
  0x2a   : > { %p35_p4 = scmp.eq.s32.totalorder %s826_s15, 0  ;;  %p651_p6 = scmp.lt.s32.totalorder %s826_s15, 2 }
  0x2b   : > { %s941_s17 = scalar_select %p25_p2, %s822_s14, %s27_s25  }
  0x2c   : > { %p36_p8 = por %p35_p4, %p34_p1  ;;  %p1079_p10 = scmp.eq.s32.totalorder %s875_s16, 1 }
  0x2d   : > { %s148_s27 = sand.u32 1, %s822_s14   ;;  %s554_s28 = sshll.u32 %s826_s15, 7 }
  0x2e   : > { %p945_p12 = por %p1079_p10, %p34_p1  ;;  %s553_s29 = sshll.u32 %s148_s27, 3 }
  0x2f   : > { %s954_s4 = scalar_lea.hbm %s1068_s0, %s554_s28  ;;  %s152_s22 = scalar_lea.vmem [#allocation2], %s553_s29 }
  0x30   : > { %s159_s25 = sshll.u32 %s152_s22, 4  ;;  %p956_p11 = pnand %p651_p6, %p36_p8  ;;  %s960_s25 = int_to_ptr.vmem [resolvable:$true] %s159_s25 }
  0x31   : > { %s149_s5 = scalar_lea.sflag [#allocation3], %s148_s27  ;;  %s726_s6 = scalar_lea.hbm %s954_s4, 128 }
  0x32   : > { %p727_p13 = scmp.ne.s32.totalorder %s954_s4, %s726_s6  ;;  %p728_p0 = pneg %p956_p11 }
  0x33   : > { %s731_s9 = scalar_lea.hbm %s1068_s0, 256  ;;  %p732_p7 = scmp.lt.u32.totalorder %s954_s4, %s1068_s0 }
  0x34   : > { %p729_p3 = pnand %p728_p0, %p727_p13  ;;  %p733_p9 = scmp.lt.u32.totalorder %s731_s9, %s726_s6 }
  0x35   : > { %p735_p1 = scmp.lt.u32.totalorder %s726_s6, %s954_s4 }
  0x36   : > { %p730_p5 = pneg %p729_p3  ;;  %p734_p2 = por %p733_p9, %p732_p7 }
  0x38   : > { %p736_p4 = por %p735_p1, %p734_p2 }
  0x3a   : > { %p737_p6 = pnand %p736_p4, %p730_p5 }
  0x3c   : > { %740 = shalt.err (!%p737_p6)
}
  0x3d   : > { %s741_s27 = scalar_lea.vmem %s960_s25, 128  ;;  %s831_s28 = smov [#allocation2]  }
  0x3e   : > { %p742_p8 = scmp.ne.s32.totalorder %s960_s25, %s741_s27  ;;  %s746_s29 = sshll.u32 %s831_s28, 4  ;;  %s747_s29 = int_to_ptr.vmem [resolvable:$false] %s746_s29 }
  0x3f   : > { %s748_s23 = scalar_lea.vmem %s747_s29, 256  ;;  %p749_p3 = scmp.lt.s32.totalorder %s960_s25, %s747_s29 }
  0x40   : > { %p744_p10 = pnand %p742_p8, %p728_p0  ;;  %p750_p7 = scmp.lt.s32.totalorder %s748_s23, %s741_s27 }
  0x42   : > { %p745_p13 = pneg %p744_p10  ;;  %p751_p9 = por %p750_p7, %p749_p3 }
  0x44   : > { %p752_p2 = pnand %p751_p9, %p745_p13 }
  0x46   : > { %755 = shalt.err (!%p752_p2)
}
  0x47   : > { %645 = dma.hbm_to_vmem [thread:$0]  (!%p956_p11), %s954_s4, 128, %s960_s25, %s149_s5  }
  0x48   : > { %p1082_p5 = scmp.ne.s32.totalorder %s1077_s20, 0 }
  0x49   : > { %s990_s30 = sand.u32 (!%p1082_p5), 1, %s818_s13   ;;  %p1083_p0 = scmp.ne.s32.totalorder (!%p1082_p5), %s1075_s18, 0 }
  0x4a   : > { %168 = sbr.rel (%p1082_p5) target bundleno = 624 (0x270), region = 32  ;;  %s556_s22 = sshll.u32 (!%p1082_p5), %s990_s30, 3 }
  0x4b   : > { %s171_s6 = scalar_lea.sflag (!%p1082_p5), [#allocation3], %s990_s30  ;;  %s996_s7 = scalar_lea.vmem (!%p1082_p5), [#allocation2], %s556_s22 }
  0x51   : > { %801 = dma.done.wait (%p1083_p0), %s171_s6, 128  }
  0x52   : > { %803 = vsyncadd (%p1083_p0), %s171_s6, 4294967168  ;;  %p1084_p11 = scmp.eq.s32.totalorder %s875_s16, 0 }
  0x54   : > { %805 = dma.done.wait (%p1084_p11), [#allocation6], 8192   ;;  %p1085_p1 = pmov %p1084_p11 }
  0x55   : > { %v832_v0 = vmov 0.0   ;;  %v203_v1 = vld [vmem:[#allocation5 + $0x8] sm:$0xff]  ;;  %v205_v2 = vld [vmem:[#allocation5 + $0x18] sm:$0xff]  ;;  %v202_v3 = vld [vmem:[#allocation5] sm:$0xff]  ;;  %s563_s26 = sshll.u32 %s875_s16, 7  ;;  %s200_s5 = scalar_lea.vmem [#allocation7], %s556_s22 }
  0x56   : > { %807 = vsyncadd (%p1085_p1), [#allocation6], 4294959104  ;;  %310 = vmatprep.mubr.f32.mxu0 %v832_v0  ;;  %437 = vmatprep.mubr.f32.mxu1 %v832_v0  ;;  %v566_v4 = vpack.c.bf16 %v205_v2, %v203_v1  ;;  %v204_v5 = vld [vmem:[#allocation5 + $0x10] sm:$0xff]  ;;  %v207_v6 = vld [vmem:[#allocation5 + $0x28] sm:$0xff]  ;;  %s469_s8 = sshll.u32 %s200_s5, 4  ;;  %s1024_s11 = scalar_lea.hbm %s1071_s3, %s563_s26  ;;  %s1026_s8 = int_to_ptr.vmem [resolvable:$true] %s469_s8 }
  0x57   : > { %v209_v7 = vld [vmem:[#allocation5 + $0x38] sm:$0xff]  ;;  %v568_v8 = vpack.c.bf16 %v204_v5, %v202_v3  ;;  %v206_v10 = vld [vmem:[#allocation5 + $0x20] sm:$0xff]  ;;  %v208_v11 = vld [vmem:[#allocation5 + $0x30] sm:$0xff]  ;;  %s456_s27 = scalar_lea.sflag [#allocation4], %s990_s30  ;;  %s756_s28 = scalar_lea.vmem %s1026_s8, 128 }
  0x58   : > { %v570_v9 = vpack.c.bf16 %v209_v7, %v207_v6  ;;  %v211_v12 = vld [vmem:[#allocation5 + $0x48] sm:$0xff]  ;;  %567 = vmatprep.subr.bf16.mxu0 %v566_v4  ;;  %v213_v13 = vld [vmem:[#allocation5 + $0x58] sm:$0xff]  ;;  %v572_v14 = vpack.c.bf16 %v208_v11, %v206_v10  ;;  %v210_v16 = vld [vmem:[#allocation5 + $0x40] sm:$0xff]  ;;  %p757_p4 = scmp.ne.s32.totalorder %s1026_s8, %s756_s28  ;;  %s833_s16 = smov [#allocation7]  }
  0x59   : > { %569 = vmatpush1.bf16.msra.mxu0 %v568_v8  ;;  %v574_v15 = vpack.c.bf16 %v213_v13, %v211_v12  ;;  %v212_v17 = vld [vmem:[#allocation5 + $0x50] sm:$0xff]  ;;  %v215_v18 = vld [vmem:[#allocation5 + $0x68] sm:$0xff]  ;;  %v217_v19 = vld [vmem:[#allocation5 + $0x78] sm:$0xff]  ;;  %s760_s29 = sshll.u32 %s833_s16, 4  ;;  %s761_s29 = int_to_ptr.vmem [resolvable:$false] %s760_s29 }
  0x5a   : > { %571 = vmatprep.subr.bf16.mxu0 %v570_v9  ;;  %v576_v20 = vpack.c.bf16 %v212_v17, %v210_v16  ;;  %v578_v21 = vpack.c.bf16 %v217_v19, %v215_v18  ;;  %v214_v22 = vld [vmem:[#allocation5 + $0x60] sm:$0xff]  ;;  %v216_v23 = vld [vmem:[#allocation5 + $0x70] sm:$0xff]  ;;  %v219_v24 = vld [vmem:[#allocation5 + $0x88] sm:$0xff]  ;;  %p758_p6 = pnand %p757_p4, %p945_p12  ;;  %s762_s23 = scalar_lea.vmem %s761_s29, 256 }
  0x5b   : > { %v221_v25 = vld [vmem:[#allocation5 + $0x98] sm:$0xff]  ;;  %v580_v26 = vpack.c.bf16 %v216_v23, %v214_v22  ;;  %v218_v28 = vld [vmem:[#allocation5 + $0x80] sm:$0xff]  ;;  %v220_v29 = vld [vmem:[#allocation5 + $0x90] sm:$0xff]  ;;  %p763_p10 = scmp.lt.s32.totalorder %s1026_s8, %s761_s29  ;;  %p764_p13 = scmp.lt.s32.totalorder %s762_s23, %s756_s28 }
  0x5c   : > { %v582_v27 = vpack.c.bf16 %v221_v25, %v219_v24  ;;  %v223_v30 = vld [vmem:[#allocation5 + $0xa8] sm:$0xff]  ;;  %v225_v31 = vld [vmem:[#allocation5 + $0xb8] sm:$0xff]  ;;  %v584_v32 = vpack.c.bf16 %v220_v29, %v218_v28  ;;  %v222_v34 = vld [vmem:[#allocation5 + $0xa0] sm:$0xff]  ;;  %p759_p8 = pneg %p758_p6 }
  0x5d   : > { %573 = vmatpush1.bf16.msra.mxu0 %v572_v14  ;;  %v586_v33 = vpack.c.bf16 %v225_v31, %v223_v30  ;;  %v224_v35 = vld [vmem:[#allocation5 + $0xb0] sm:$0xff]  ;;  %v227_v36 = vld [vmem:[#allocation5 + $0xc8] sm:$0xff]  ;;  %v229_v37 = vld [vmem:[#allocation5 + $0xd8] sm:$0xff]  ;;  %p765_p3 = por %p764_p13, %p763_p10 }
  0x5e   : > { %575 = vmatprep.subr.bf16.mxu0 %v574_v15  ;;  %v588_v38 = vpack.c.bf16 %v224_v35, %v222_v34  ;;  %v590_v39 = vpack.c.bf16 %v229_v37, %v227_v36  ;;  %v226_v40 = vld [vmem:[#allocation5 + $0xc0] sm:$0xff]  ;;  %v228_v41 = vld [vmem:[#allocation5 + $0xd0] sm:$0xff]  ;;  %v231_v42 = vld [vmem:[#allocation5 + $0xe8] sm:$0xff]  ;;  %v236_v34 = vlaneseq }
  0x5f   : > { %v233_v43 = vld [vmem:[#allocation5 + $0xf8] sm:$0xff]  ;;  %v592_v44 = vpack.c.bf16 %v228_v41, %v226_v40  ;;  %v230_v46 = vld [vmem:[#allocation5 + $0xe0] sm:$0xff]  ;;  %v232_v47 = vld [vmem:[#allocation5 + $0xf0] sm:$0xff]  ;;  %p766_p7 = pnand %p765_p3, %p759_p8 }
  0x60   : > { %v594_v45 = vpack.c.bf16 %v233_v43, %v231_v42  ;;  %v596_v48 = vpack.c.bf16 %v232_v47, %v230_v46  ;;  %v1007_v49 = vld [vmem:[%s996_s7] sm:$0xff]  ;;  %v329_v50 = vld [vmem:[#allocation5 + $0x108] sm:$0xff]  ;;  %v328_v53 = vld [vmem:[#allocation5 + $0x100] sm:$0xff]  ;;  %v237_v35 = vshrl.u32 %v236_v34, 7 }
  0x61   : > { %577 = vmatpush1.bf16.msra.mxu0 %v576_v20  ;;  %v331_v51 = vld [vmem:[#allocation5 + $0x118] sm:$0xff]  ;;  %v330_v54 = vld [vmem:[#allocation5 + $0x110] sm:$0xff]  ;;  %v333_v56 = vld [vmem:[#allocation5 + $0x128] sm:$0xff] }
  0x62   : > { %579 = vmatprep.subr.bf16.mxu0 %v578_v21  ;;  %v598_v52 = vpack.c.bf16 %v331_v51, %v329_v50  ;;  %v600_v55 = vpack.c.bf16 %v330_v54, %v328_v53  ;;  %v335_v57 = vld [vmem:[#allocation5 + $0x138] sm:$0xff]  ;;  %v332_v59 = vld [vmem:[#allocation5 + $0x120] sm:$0xff]  ;;  %v334_v60 = vld [vmem:[#allocation5 + $0x130] sm:$0xff]  ;;  %v242_v36 = vsub.s32 1, %v237_v35  ;;  %v238_v43 = vsub.s32 0, %v237_v35 }
  0x63   : > { %v602_v58 = vpack.c.bf16 %v335_v57, %v333_v56  ;;  %v604_v61 = vpack.c.bf16 %v334_v60, %v332_v59  ;;  %v337_v62 = vld [vmem:[#allocation5 + $0x148] sm:$0xff]  ;;  %v339_v63 = vld [vmem:[#allocation5 + $0x158] sm:$0xff]  ;;  %v336_v1 = vld [vmem:[#allocation5 + $0x140] sm:$0xff] }
  0x64   : > { %599 = vmatprep.subr.bf16.mxu1 %v598_v52  ;;  %v606_v0 = vpack.c.bf16 %v339_v63, %v337_v62  ;;  %v338_v2 = vld [vmem:[#allocation5 + $0x150] sm:$0xff]  ;;  %v341_v4 = vld [vmem:[#allocation5 + $0x168] sm:$0xff]  ;;  %v343_v5 = vld [vmem:[#allocation5 + $0x178] sm:$0xff] }
  0x65   : > { %581 = vmatpush1.bf16.msra.mxu0 %v580_v26  ;;  %601 = vmatpush1.bf16.msra.mxu1 %v600_v55  ;;  %v608_v3 = vpack.c.bf16 %v338_v2, %v336_v1  ;;  %v610_v6 = vpack.c.bf16 %v343_v5, %v341_v4  ;;  %v340_v7 = vld [vmem:[#allocation5 + $0x160] sm:$0xff]  ;;  %v342_v8 = vld [vmem:[#allocation5 + $0x170] sm:$0xff]  ;;  %v345_v10 = vld [vmem:[#allocation5 + $0x188] sm:$0xff] }
  0x66   : > { %583 = vmatprep.subr.bf16.mxu0 %v582_v27  ;;  %603 = vmatprep.subr.bf16.mxu1 %v602_v58  ;;  %v612_v9 = vpack.c.bf16 %v342_v8, %v340_v7  ;;  %v347_v11 = vld [vmem:[#allocation5 + $0x198] sm:$0xff]  ;;  %v344_v13 = vld [vmem:[#allocation5 + $0x180] sm:$0xff]  ;;  %v346_v14 = vld [vmem:[#allocation5 + $0x190] sm:$0xff] }
  0x67   : > { %v614_v12 = vpack.c.bf16 %v347_v11, %v345_v10  ;;  %v616_v15 = vpack.c.bf16 %v346_v14, %v344_v13  ;;  %v349_v16 = vld [vmem:[#allocation5 + $0x1a8] sm:$0xff]  ;;  %v351_v17 = vld [vmem:[#allocation5 + $0x1b8] sm:$0xff]  ;;  %v348_v18 = vld [vmem:[#allocation5 + $0x1a0] sm:$0xff] }
  0x68   : > { %v618_v19 = vpack.c.bf16 %v351_v17, %v349_v16  ;;  %v350_v20 = vld [vmem:[#allocation5 + $0x1b0] sm:$0xff]  ;;  %v353_v21 = vld [vmem:[#allocation5 + $0x1c8] sm:$0xff]  ;;  %v355_v22 = vld [vmem:[#allocation5 + $0x1d8] sm:$0xff] }
  0x69   : > { %585 = vmatpush1.bf16.msra.mxu0 %v584_v32  ;;  %605 = vmatpush1.bf16.msra.mxu1 %v604_v61  ;;  %v620_v23 = vpack.c.bf16 %v350_v20, %v348_v18  ;;  %v622_v24 = vpack.c.bf16 %v355_v22, %v353_v21  ;;  %v352_v25 = vld [vmem:[#allocation5 + $0x1c0] sm:$0xff]  ;;  %v354_v26 = vld [vmem:[#allocation5 + $0x1d0] sm:$0xff]  ;;  %v357_v27 = vld [vmem:[#allocation5 + $0x1e8] sm:$0xff] }
  0x6a   : > { %587 = vmatprep.subr.bf16.mxu0 %v586_v33  ;;  %607 = vmatprep.subr.bf16.mxu1 %v606_v0  ;;  %v359_v28 = vld [vmem:[#allocation5 + $0x1f8] sm:$0xff]  ;;  %v624_v29 = vpack.c.bf16 %v354_v26, %v352_v25  ;;  %v356_v31 = vld [vmem:[#allocation5 + $0x1e0] sm:$0xff]  ;;  %v358_v32 = vld [vmem:[#allocation5 + $0x1f0] sm:$0xff] }
  0x6b   : > { %v626_v30 = vpack.c.bf16 %v359_v28, %v357_v27  ;;  %v628_v33 = vpack.c.bf16 %v358_v32, %v356_v31  ;;  %v234_v37 = vld [vmem:[%s1070_s2] sm:$0x3]  ;;  %v560_v54 = vld [vmem:[%s1070_s2 + $0x2] sm:$0x3] }
  0x6c   : > { %v370_v55 = vrot.slane %v560_v54, %v242_v36  ;;  %v366_v61 = vrot.slane %v560_v54, %v238_v43 }
  0x6d   : > { %589 = vmatpush1.bf16.msra.mxu0 %v588_v38  ;;  %609 = vmatpush1.bf16.msra.mxu1 %v608_v3  ;;  %v243_v38 = vrot.slane %v234_v37, %v242_v36 }
  0x6e   : > { %591 = vmatprep.subr.bf16.mxu0 %v590_v39  ;;  %611 = vmatprep.subr.bf16.mxu1 %v610_v6 }
  0x71   : > { %593 = vmatpush1.bf16.msra.mxu0 %v592_v44  ;;  %613 = vmatpush1.bf16.msra.mxu1 %v612_v9 }
  0x72   : > { %595 = vmatprep.subr.bf16.mxu0 %v594_v45  ;;  %615 = vmatprep.subr.bf16.mxu1 %v614_v12  ;;  %v239_v45 = vrot.slane %v234_v37, %v238_v43 }
  0x75   : > { %597 = vmatpush1.bf16.msra.mxu0 %v596_v48  ;;  %617 = vmatpush1.bf16.msra.mxu1 %v616_v15 }
  0x76   : > { %619 = vmatprep.subr.bf16.mxu1 %v618_v19 }
  0x78   : > { %311 = vmatmul.mubr.f32.vlgmr.msra.gmra.mrb[0].mxu0 %v1007_v49 }
  0x79   : > { %621 = vmatpush1.bf16.msra.mxu1 %v620_v23 }
  0x7a   : > { %623 = vmatprep.subr.bf16.mxu1 %v622_v24 }
  0x7d   : > { %625 = vmatpush1.bf16.msra.mxu1 %v624_v29 }
  0x7e   : > { %627 = vmatprep.subr.bf16.mxu1 %v626_v30 }
  0x81   : > { %629 = vmatpush1.bf16.msra.mxu1 %v628_v33 }
 0x14b   : > { %v312_v39 = vpop.f32.mrb[0].mxu0 }
 0x14c   : > { %v314_v40 = vpop.f32.mrb[1].mxu0  ;;  %v313_v47 = vadd.f32 %v312_v39, %v239_v45 }
 0x14d   : > { %v315_v41 = vadd.f32 %v314_v40, %v243_v38 }
 0x14e   : > { %v317_v48 = vmax.f32 %v313_v47, 0.0 }
 0x14f   : > { %v559_v42 = vmul.f32 -1.442695, %v315_v41 }
 0x150   : > { %v324_v50 = vsub.f32 %v317_v48, %v1007_v49 }
 0x151   : > { %690 = vpow2.f32 %v559_v42 }
 0x15b   : > { %v691_v44 = vpop.eup %690 }
 0x15c   : > { %v321_v46 = vadd.f32 1.0, %v691_v44 }
 0x15e   : > { %692 = vrcp.f32 %v321_v46 }
 0x168   : > { %v693_v51 = vpop.eup %692 }
 0x169   : > { %v325_v52 = vmul.f32 %v693_v51, %v324_v50 }
 0x16b   : > { %v326_v53 = vadd.f32 %v325_v52, %v1007_v49 }
 0x16d   : > { %438 = vmatmul.mubr.f32.vlgmr.msra.gmra.mrb[0].mxu1 %v326_v53 }
 0x240   : > { %v439_v56 = vpop.f32.mrb[0].mxu1 }
 0x241   : > { %v441_v57 = vpop.f32.mrb[1].mxu1  ;;  %v440_v49 = vadd.f32 %v439_v56, %v366_v61 }
 0x242   : > { %v442_v58 = vadd.f32 %v441_v57, %v370_v55 }
 0x243   : > { %v444_v63 = vmax.f32 %v440_v49, 0.0 }
 0x244   : > { %v561_v59 = vmul.f32 -1.442695, %v442_v58 }
 0x245   : > { %v451_v0 = vsub.f32 %v444_v63, %v326_v53 }
 0x246   : > { %694 = vpow2.f32 %v561_v59 }
 0x250   : > { %v695_v60 = vpop.eup %694 }
 0x251   : > { %v448_v62 = vadd.f32 1.0, %v695_v60 }
 0x253   : > { %696 = vrcp.f32 %v448_v62 }
 0x25d   : > { %v697_v1 = vpop.eup %696 }
 0x25e   : > { %v452_v2 = vmul.f32 %v697_v1, %v451_v0 }
 0x260   : > { %v453_v3 = vadd.f32 %v452_v2, %v326_v53 }
 0x262   : > { %454 = vst [vmem:[%s200_s5] sm:$0xff] %v453_v3 }
 0x263   : > { %769 = shalt.err (!%p766_p7)
}
 0x264   : > { %s770_s30 = scalar_lea.hbm %s1024_s11, 128  ;;  %s774_s7 = scalar_lea.hbm %s1071_s3, 256 }
 0x265   : > { %p771_p9 = scmp.ne.s32.totalorder %s1024_s11, %s770_s30  ;;  %p775_p0 = scmp.lt.u32.totalorder %s1024_s11, %s1071_s3 }
 0x266   : > { %p776_p11 = scmp.lt.u32.totalorder %s774_s7, %s770_s30  ;;  %p778_p4 = scmp.lt.u32.totalorder %s770_s30, %s1024_s11 }
 0x267   : > { %p772_p2 = pnand %p771_p9, %p945_p12 }
 0x268   : > { %p777_p1 = por %p776_p11, %p775_p0 }
 0x269   : > { %p773_p5 = pneg %p772_p2 }
 0x26a   : > { %p779_p6 = por %p778_p4, %p777_p1 }
 0x26c   : > { %p780_p8 = pnand %p779_p6, %p773_p5 }
 0x26e   : > { %783 = shalt.err (!%p780_p8)
}
 0x26f   : > { %636 = dma.vmem_to_hbm [thread:$0]  (%p945_p12), %s1026_s8, 128, %s1024_s11, %s456_s27  }
 0x270 PF: > { %s481_s4 = sand.u32 1, %s814_s12   ;;  %p1086_p10 = scmp.ne.s32.totalorder %s1076_s19, 0 }
 0x271   : > { %p1087_p13 = scmp.ge.s32.totalorder %s826_s15, 2  ;;  %s482_s25 = scalar_lea.sflag [#allocation4], %s481_s4 }
 0x273   : > { %p647_p3 = pnand %p1087_p13, %p1086_p10 }
 0x275   : > { %809 = dma.done.wait (!%p647_p3), %s482_s25, 128  }
 0x276   : > { %811 = vsyncadd (!%p647_p3), %s482_s25, 4294967168  ;;  %p17_p7 = scmp.ge.s32.totalorder %s910_s24, 4   ;;  %s1088_s12 = smov %s818_s13 }
 0x277   : > { %s1089_s13 = smov %s822_s14  ;;  %s1090_s14 = smov %s941_s17 }
 0x278   : > { %s1091_s15 = smov %s910_s24  ;;  %19 = sbr.rel (!%p17_p7) target bundleno = 6 (0x6), region = 83 }
 0x27f   :  { %487 = vsyncpa [#allocation3], 1 }
 0x280   :  { %489 = vsyncpa [#allocation3 + $0x1], 1 }
 0x281   :  { %490 = vsyncpa [#allocation6], 1 }
 0x282   :  { %491 = vsyncpa [#allocation4], 1 }
 0x283   :  { %493 = vsyncpa [#allocation4 + $0x1], 1 }

</bundles_post_ra>
